<compile_context>
chip_gen: v7x
topology: tpu7x:2x2x1
jax: 0.10.0
libtpu: 0.0.40
codegen_flags: <defaults>
</compile_context>

<pallas_src>
import jax
import jax.numpy as jnp
from jax.experimental import pallas as pl
from jax.experimental.pallas import tpu as pltpu

TIME_DIM = 16
SPACE_DIM = 32
HIDDEN = 100
OUT_DIM = 32

K_PAD = 64    # concat(16+32)=48 zero-padded to 64 (full-array last dim)
H_PAD = 128   # hidden 100 -> 128 lanes (lane-dense, costs no extra vregs)
O_PAD = 128   # out    32 -> 128 lanes (unmasked vst; slice real cols outside)

# Default batch tile: >=512 rows reaches ~85% of HBM roofline; at 2048 rows the
# per-tile VMEM footprint (~3.5 MiB incl. double buffering + f32 temps) fits the
# default scoped-VMEM limit on v5e/v6e (128 MiB) and v7x (64 MiB) with headroom.
DEFAULT_TILE_B = 2048


def _round_up(x, m):
    return (x + m - 1) // m * m


def fusion_kernel(x_ref, w1_ref, b1_ref, w2_ref, b2_ref, o_ref):
    # hidden = tanh(x @ W1 + b1)   -- single fused K matmul, f32 accumulation.
    h = jnp.dot(x_ref[...], w1_ref[...], preferred_element_type=jnp.float32)
    h = jnp.tanh(h + b1_ref[...])
    # Padded hidden cols are tanh(0+0)=0 and padded W2 rows are 0 -> exact.
    out = jnp.dot(h.astype(jnp.bfloat16), w2_ref[...],
                  preferred_element_type=jnp.float32)
    o_ref[...] = jnp.tanh(out + b2_ref[...])


def init_params(key, time_dim=TIME_DIM, space_dim=SPACE_DIM,
                hidden=HIDDEN, out_dim=OUT_DIM):
    """Logical params mimicking nn.Linear init; W stored (in, out)."""
    k1, k2, k3, k4 = jax.random.split(key, 4)
    in1 = time_dim + space_dim
    bound1 = 1.0 / jnp.sqrt(in1)
    bound2 = 1.0 / jnp.sqrt(hidden)
    w1 = jax.random.uniform(k1, (in1, hidden), jnp.float32, -bound1, bound1)
    b1 = jax.random.uniform(k2, (hidden,), jnp.float32, -bound1, bound1)
    w2 = jax.random.uniform(k3, (hidden, out_dim), jnp.float32, -bound2, bound2)
    b2 = jax.random.uniform(k4, (out_dim,), jnp.float32, -bound2, bound2)
    return (w1, b1, w2, b2)


def pad_params(params):
    """One-time device-layout prep: zero-pad ragged dims to 128-lane slabs and
    cast weights to bf16 (biases stay f32; accumulate is f32 in-kernel)."""
    w1, b1, w2, b2 = params
    in1, hidden = w1.shape
    out_dim = w2.shape[1]
    w1p = jnp.zeros((K_PAD, H_PAD), jnp.float32).at[:in1, :hidden].set(w1)
    b1p = jnp.zeros((1, H_PAD), jnp.float32).at[0, :hidden].set(b1)
    w2p = jnp.zeros((H_PAD, O_PAD), jnp.float32).at[:hidden, :out_dim].set(w2)
    b2p = jnp.zeros((1, O_PAD), jnp.float32).at[0, :out_dim].set(b2)
    return (w1p.astype(jnp.bfloat16), b1p, w2p.astype(jnp.bfloat16), b2p)


def fusion_net(time_features, space_features, padded_params,
               *, tile_b=DEFAULT_TILE_B, out_dim=OUT_DIM):
    """time_features: (B, 16), space_features: (B, 32) -> (B, out_dim) f32."""
    w1p, b1p, w2p, b2p = padded_params
    B = time_features.shape[0]
    in1 = time_features.shape[1] + space_features.shape[1]

    # Clamp the tile for tiny batches; keep the sublane-8 rule satisfied.
    tile_b = min(tile_b, _round_up(max(B, 8), 8))
    b_pad = _round_up(B, tile_b)

    # Fused concat + zero-pad + bf16 cast of the streamed input.
    x = jnp.concatenate([time_features, space_features], axis=1)
    x = jnp.pad(x, ((0, b_pad - B), (0, K_PAD - in1))).astype(jnp.bfloat16)

    out_padded = pl.pallas_call(
        fusion_kernel,
        out_shape=jax.ShapeDtypeStruct((b_pad, O_PAD), jnp.float32),
        grid_spec=pltpu.PrefetchScalarGridSpec(
            num_scalar_prefetch=0,
            grid=(b_pad // tile_b,),
            in_specs=[
                pl.BlockSpec((tile_b, K_PAD), lambda i: (i, 0)),   # x tile
                pl.BlockSpec((K_PAD, H_PAD), lambda i: (0, 0)),    # W1 resident
                pl.BlockSpec((1, H_PAD), lambda i: (0, 0)),        # b1 resident
                pl.BlockSpec((H_PAD, O_PAD), lambda i: (0, 0)),    # W2 resident
                pl.BlockSpec((1, O_PAD), lambda i: (0, 0)),        # b2 resident
            ],
            out_specs=pl.BlockSpec((tile_b, O_PAD), lambda i: (i, 0)),
        ),
        compiler_params=pltpu.CompilerParams(
            dimension_semantics=("parallel",),
        ),
    )(x, w1p, b1p, w2p, b2p)

    return out_padded[:B, :out_dim]


def fusion_net_ref(time_features, space_features, params):
    """Pure-f32 JAX reference matching the PyTorch forward exactly."""
    w1, b1, w2, b2 = params
    combined = jnp.concatenate([time_features, space_features], axis=1)
    h = jnp.tanh(combined @ w1 + b1)
    return jnp.tanh(h @ w2 + b2)


def fusion_net_ref_bf16(time_features, space_features, params):
    """Reference with the same bf16 casts the kernel uses (tight comparison)."""
    w1, b1, w2, b2 = params
    x = jnp.concatenate([time_features, space_features], axis=1).astype(jnp.bfloat16)
    h = jnp.tanh(jnp.dot(x, w1.astype(jnp.bfloat16),
                         preferred_element_type=jnp.float32) + b1)
    out = jnp.dot(h.astype(jnp.bfloat16), w2.astype(jnp.bfloat16),
                  preferred_element_type=jnp.float32) + b2
    return jnp.tanh(out)


if __name__ == "__main__":
    key = jax.random.PRNGKey(0)
    k_t, k_s, k_p = jax.random.split(key, 3)

    batch = 8
    time_features = jax.random.normal(k_t, (batch, TIME_DIM), jnp.float32)
    space_features = jax.random.normal(k_s, (batch, SPACE_DIM), jnp.float32)

    params = init_params(k_p)
    padded_params = pad_params(params)

    out = fusion_net(time_features, space_features, padded_params)
    out = jax.block_until_ready(out)
    assert out.shape == (batch, OUT_DIM)

    # Tight check against a bf16-matched reference (validates kernel wiring).
    ref_bf16 = fusion_net_ref_bf16(time_features, space_features, params)
    assert jnp.allclose(out, ref_bf16, atol=1e-3, rtol=1e-3)

    # Loose check against the exact f32 PyTorch-equivalent forward
    # (bf16 input/weight streaming introduces ~1e-2 absolute error at most).
    ref_f32 = fusion_net_ref(time_features, space_features, params)
    assert jnp.allclose(out, ref_f32, atol=5e-2)

    print("KERNEL_OK")
</pallas_src>

<mosaic_0001>
module attributes {stable_mosaic.version = 11 : i64} {
  func.func @fusion_kernel(%arg0: i32, %arg1: memref<8x64xbf16, #tpu.memory_space<vmem>>, %arg2: memref<64x128xbf16, #tpu.memory_space<vmem>>, %arg3: memref<1x128xf32, #tpu.memory_space<vmem>>, %arg4: memref<128x128xbf16, #tpu.memory_space<vmem>>, %arg5: memref<1x128xf32, #tpu.memory_space<vmem>>, %arg6: memref<8x128xf32, #tpu.memory_space<vmem>>) attributes {dimension_semantics = [#tpu.dimension_semantics<parallel>], iteration_bounds = array<i64: 1>, scalar_prefetch = 0 : i64, scratch_operands = 0 : i64, tpu.core_type = #tpu.core_type<tc>, window_params = [{transform_indices = @transform_0, window_bounds = array<i64: 8, 64>}, {pipeline_mode = #tpu.pipeline_mode<synchronous>, transform_indices = @transform_1, window_bounds = array<i64: 64, 128>}, {pipeline_mode = #tpu.pipeline_mode<synchronous>, transform_indices = @transform_2, window_bounds = array<i64: 1, 128>}, {pipeline_mode = #tpu.pipeline_mode<synchronous>, transform_indices = @transform_3, window_bounds = array<i64: 128, 128>}, {pipeline_mode = #tpu.pipeline_mode<synchronous>, transform_indices = @transform_4, window_bounds = array<i64: 1, 128>}, {transform_indices = @transform_5, window_bounds = array<i64: 8, 128>}]} {
    %c0 = arith.constant 0 : index
    %c0_0 = arith.constant 0 : index
    %0 = vector.load %arg1[%c0, %c0_0] : memref<8x64xbf16, #tpu.memory_space<vmem>>, vector<8x64xbf16>
    %c0_1 = arith.constant 0 : index
    %c0_2 = arith.constant 0 : index
    %1 = vector.load %arg2[%c0_1, %c0_2] : memref<64x128xbf16, #tpu.memory_space<vmem>>, vector<64x128xbf16>
    %cst = arith.constant dense<0.000000e+00> : vector<8x128xf32>
    %2 = tpu.matmul %0, %1, %cst {dimension_numbers = #tpu.dot_dimension_numbers<[1], [0], [0], [1], [0, 0, 1, 1], [], []>} : vector<8x64xbf16>, vector<64x128xbf16>, vector<8x128xf32> -> vector<8x128xf32>
    %c0_3 = arith.constant 0 : index
    %c0_4 = arith.constant 0 : index
    %3 = vector.load %arg3[%c0_3, %c0_4] : memref<1x128xf32, #tpu.memory_space<vmem>>, vector<1x128xf32>
    %4 = vector.broadcast %3 : vector<1x128xf32> to vector<8x128xf32>
    %5 = arith.addf %2, %4 : vector<8x128xf32>
    %6 = math.tanh %5 : vector<8x128xf32>
    %7 = arith.truncf %6 : vector<8x128xf32> to vector<8x128xbf16>
    %c0_5 = arith.constant 0 : index
    %c0_6 = arith.constant 0 : index
    %8 = vector.load %arg4[%c0_5, %c0_6] : memref<128x128xbf16, #tpu.memory_space<vmem>>, vector<128x128xbf16>
    %cst_7 = arith.constant dense<0.000000e+00> : vector<8x128xf32>
    %9 = tpu.matmul %7, %8, %cst_7 {dimension_numbers = #tpu.dot_dimension_numbers<[1], [0], [0], [1], [0, 0, 1, 1], [], []>} : vector<8x128xbf16>, vector<128x128xbf16>, vector<8x128xf32> -> vector<8x128xf32>
    %c0_8 = arith.constant 0 : index
    %c0_9 = arith.constant 0 : index
    %10 = vector.load %arg5[%c0_8, %c0_9] : memref<1x128xf32, #tpu.memory_space<vmem>>, vector<1x128xf32>
    %11 = vector.broadcast %10 : vector<1x128xf32> to vector<8x128xf32>
    %12 = arith.addf %9, %11 : vector<8x128xf32>
    %13 = math.tanh %12 : vector<8x128xf32>
    %c0_10 = arith.constant 0 : index
    %c0_11 = arith.constant 0 : index
    %14 = vector.load %arg6[%c0_10, %c0_11] : memref<8x128xf32, #tpu.memory_space<vmem>>, vector<8x128xf32>
    tpu.vector_store %arg6[%c0_10, %c0_11], %13 {strides = array<i32>} : memref<8x128xf32, #tpu.memory_space<vmem>>, vector<8x128xf32>,
    return
  }
  func.func @transform_0(%arg0: i32) -> (i32, i32) {
    %c0_i32 = arith.constant 0 : i32
    %c0_i32_0 = arith.constant 0 : i32
    return %arg0, %c0_i32 : i32, i32
  }
  func.func @transform_1(%arg0: i32) -> (i32, i32) {
    %c0_i32 = arith.constant 0 : i32
    %c0_i32_0 = arith.constant 0 : i32
    %c0_i32_1 = arith.constant 0 : i32
    return %c0_i32, %c0_i32_0 : i32, i32
  }
  func.func @transform_2(%arg0: i32) -> (i32, i32) {
    %c0_i32 = arith.constant 0 : i32
    %c0_i32_0 = arith.constant 0 : i32
    %c0_i32_1 = arith.constant 0 : i32
    return %c0_i32, %c0_i32_0 : i32, i32
  }
  func.func @transform_3(%arg0: i32) -> (i32, i32) {
    %c0_i32 = arith.constant 0 : i32
    %c0_i32_0 = arith.constant 0 : i32
    %c0_i32_1 = arith.constant 0 : i32
    return %c0_i32, %c0_i32_0 : i32, i32
  }
  func.func @transform_4(%arg0: i32) -> (i32, i32) {
    %c0_i32 = arith.constant 0 : i32
    %c0_i32_0 = arith.constant 0 : i32
    %c0_i32_1 = arith.constant 0 : i32
    return %c0_i32, %c0_i32_0 : i32, i32
  }
  func.func @transform_5(%arg0: i32) -> (i32, i32) {
    %c0_i32 = arith.constant 0 : i32
    %c0_i32_0 = arith.constant 0 : i32
    return %arg0, %c0_i32 : i32, i32
  }
}

</mosaic_0001>

<bundles_post_ra>
// kernel: tpu_custom_call.1
= control target key start
LH: loop header
LB: loop body
LE: loop exit
PB: predicated region body
PF: predicated region fallthrough
CT: control target
= control target key end

     0   :  { %10 = vsyncpa [#allocation3], 0  ;;  %s553_s0 = inlined_call_operand.hbm [shape: bf16[8,64], index: 0, kind: input, shape index: {}]   ;;  %s554_s1 = inlined_call_operand.hbm [shape: bf16[64,128], index: 1, kind: input, shape index: {}]   ;;  %s555_s2 = inlined_call_operand.vmem [shape: f32[1,128], index: 2, kind: input, shape index: {}]   ;;  %s556_s3 = inlined_call_operand.hbm [shape: bf16[128,128], index: 3, kind: input, shape index: {}]   ;;  %s557_s4 = inlined_call_operand.vmem [shape: f32[1,128], index: 4, kind: input, shape index: {}]   ;;  %s558_s5 = inlined_call_operand.hbm [shape: f32[8,128], index: 5, kind: output, shape index: {}]  }
   0x1   :  { %11 = vsyncpa [#allocation6], 0 }
   0x2   :  { %12 = vsyncpa [#allocation4], 0  ;;  %s455_s18 = smov [#allocation5]   ;;  %s361_s22 = scalar_lea.hbm %s554_s1, 512 }
   0x3   :  { %s28_s19 = sshll.u32 %s455_s18, 4  ;;  %p362_p0 = scmp.ne.s32.totalorder %s554_s1, %s361_s22  ;;  %s29_s19 = int_to_ptr.vmem [resolvable:$true] %s28_s19 }
   0x4   :  { %p365_p1 = scmp.lt.u32.totalorder %s361_s22, %s554_s1 }
   0x6   :  { %p367_p2 = pnand %p365_p1, %p362_p0 }
   0x8   :  { %370 = shalt.err (!%p367_p2)
}
   0x9   :  { %s371_s27 = scalar_lea.vmem %s29_s19, 512  ;;  %p376_p4 = scmp.lt.s32.totalorder %s29_s19, %s29_s19 }
   0xa   :  { %p372_p3 = scmp.ne.s32.totalorder %s29_s19, %s371_s27  ;;  %p377_p5 = scmp.lt.s32.totalorder %s371_s27, %s371_s27 }
   0xc   :  { %p378_p6 = por %p377_p5, %p376_p4 }
   0xe   :  { %p379_p7 = pnand %p378_p6, %p372_p3 }
  0x10   :  { %382 = shalt.err (!%p379_p7)
}
  0x11   :  { %s456_s28 = smov 64   ;;  %s457_s29 = smov 4  }
  0x12   :  { %34 = dma.hbm_to_vmem [thread:$0]  %s554_s1, 512, %s29_s19, [#allocation6], %s456_s28, %s456_s28, %s457_s29  }
  0x13   :  { %s458_s7 = smov [#allocation2]   ;;  %s459_s9 = smov [#allocation7]  }
  0x14   :  { %s19_s8 = sshll.u32 %s458_s7, 4  ;;  %s42_s10 = sshll.u32 %s459_s9, 4  ;;  %s20_s8 = int_to_ptr.vmem [resolvable:$true] %s19_s8  ;;  %s43_s10 = int_to_ptr.vmem [resolvable:$true] %s42_s10 }
  0x15   :  { %s383_s13 = scalar_lea.hbm %s553_s0, 64 }
  0x16   :  { %p384_p8 = scmp.ne.s32.totalorder %s553_s0, %s383_s13  ;;  %p387_p9 = scmp.lt.u32.totalorder %s383_s13, %s553_s0 }
  0x18   :  { %p389_p10 = pnand %p387_p9, %p384_p8 }
  0x1a   :  { %392 = shalt.err (!%p389_p10)
}
  0x1b   :  { %s393_s1 = scalar_lea.vmem %s20_s8, 64  ;;  %p398_p12 = scmp.lt.s32.totalorder %s20_s8, %s20_s8 }
  0x1c   :  { %p394_p11 = scmp.ne.s32.totalorder %s20_s8, %s393_s1  ;;  %p399_p13 = scmp.lt.s32.totalorder %s393_s1, %s393_s1 }
  0x1e   :  { %p400_p0 = por %p399_p13, %p398_p12 }
  0x20   :  { %p401_p1 = pnand %p400_p0, %p394_p11 }
  0x22   :  { %404 = shalt.err (!%p401_p1)
}
  0x23   :  { %22 = dma.hbm_to_vmem [thread:$0]  %s553_s0, 64, %s20_s8, [#allocation3]  }
  0x24   :  { %s405_s22 = scalar_lea.hbm %s556_s3, 1024 }
  0x25   :  { %p406_p2 = scmp.ne.s32.totalorder %s556_s3, %s405_s22  ;;  %p409_p3 = scmp.lt.u32.totalorder %s405_s22, %s556_s3 }
  0x27   :  { %p411_p4 = pnand %p409_p3, %p406_p2 }
  0x29   :  { %414 = shalt.err (!%p411_p4)
}
  0x2a   :  { %s415_s27 = scalar_lea.vmem %s43_s10, 1024  ;;  %p420_p6 = scmp.lt.s32.totalorder %s43_s10, %s43_s10 }
  0x2b   :  { %p416_p5 = scmp.ne.s32.totalorder %s43_s10, %s415_s27  ;;  %p421_p7 = scmp.lt.s32.totalorder %s415_s27, %s415_s27 }
  0x2d   :  { %p422_p8 = por %p421_p7, %p420_p6 }
  0x2f   :  { %p423_p9 = pnand %p422_p8, %p416_p5 }
  0x31   :  { %426 = shalt.err (!%p423_p9)
}
  0x32   :  { %48 = dma.hbm_to_vmem [thread:$0]  %s556_s3, 1024, %s43_s10, [#allocation6], %s456_s28, %s456_s28, %s457_s29  }
  0x33   :  { %449 = dma.done.wait [#allocation3], 64  }
  0x34   :  { %450 = vsyncadd [#allocation3], 4294967232 }
  0x35   :  { %451 = dma.done.wait [#allocation6], 1536  }
  0x36   :  { %452 = vsyncadd [#allocation6], 4294965760  ;;  %v460_v0 = vmov 0.0   ;;  %vm461_vm0 = vmmov 0   ;;  %v345_v1 = vld [vmem:[#allocation5] sm:$0xff]   ;;  %v346_v2 = vld [vmem:[#allocation5 + $0x8] sm:$0xff]  }
  0x37   :  { %305 = vmatprep.subr.bf16.mxu0 %v460_v0  ;;  %313 = vmatprep.mubr.msk.bf16.mxu0 %vm461_vm0, %v460_v0  ;;  %v349_v3 = vld [vmem:[#allocation7] sm:$0xff]   ;;  %v347_v4 = vld [vmem:[#allocation5 + $0x10] sm:$0xff]   ;;  %v350_v5 = vld [vmem:[#allocation7 + $0x8] sm:$0xff]   ;;  %vm101_vm1 = vcmask 523264  }
  0x38   :  { %317 = vmatprep.subr.bf16.mxu1 %v460_v0  ;;  %333 = vmatprep.mubr.msk.bf16.mxu1 %vm461_vm0, %v460_v0  ;;  %v348_v6 = vld [vmem:[#allocation5 + $0x18] sm:$0xff]   ;;  %v351_v7 = vld [vmem:[#allocation7 + $0x10] sm:$0xff]   ;;  %v353_v10 = vld [vmem:[#allocation7 + $0x20] sm:$0xff]  }
  0x39   :  { %306 = vmatpush3.bf16.msra.mxu0 %v345_v1  ;;  %318 = vmatpush3.bf16.msra.mxu1 %v349_v3  ;;  %v61_v8 = vld [vmem:[#allocation2] sm:$0xf]  ;;  %v354_v11 = vld [vmem:[#allocation7 + $0x28] sm:$0xff]   ;;  %v355_v12 = vld [vmem:[#allocation7 + $0x30] sm:$0xff]  }
  0x3a   :  { %307 = vmatprep.subr.bf16.mxu0 %v460_v0  ;;  %319 = vmatprep.subr.bf16.mxu1 %v460_v0  ;;  %v352_v9 = vld [vmem:[#allocation7 + $0x18] sm:$0xff]  }
  0x3b   :  { %v356_v13 = vld [vmem:[#allocation7 + $0x38] sm:$0xff]  }
  0x3c   :  { %v276_v14 = vld [vmem:[%s555_s2] ss:$0 sm:$0xff]  ;;  %s462_s2 = smov [#allocation8]  }
  0x3d   :  { %308 = vmatpush3.bf16.msra.mxu0 %v346_v2  ;;  %320 = vmatpush3.bf16.msra.mxu1 %v350_v5  ;;  %v282_v22 = vld [vmem:[%s557_s4] ss:$0 sm:$0xff]  ;;  %s266_s7 = sshll.u32 %s462_s2, 4  ;;  %s267_s7 = int_to_ptr.vmem [resolvable:$true] %s266_s7 }
  0x3e   :  { %309 = vmatprep.subr.bf16.mxu0 %v460_v0  ;;  %321 = vmatprep.subr.bf16.mxu1 %v460_v0  ;;  %s427_s8 = scalar_lea.vmem %s267_s7, 128  ;;  %p432_p11 = scmp.lt.s32.totalorder %s267_s7, %s267_s7 }
  0x3f   :  { %p428_p10 = scmp.ne.s32.totalorder %s267_s7, %s427_s8  ;;  %p433_p12 = scmp.lt.s32.totalorder %s427_s8, %s427_s8 }
  0x41   :  { %310 = vmatpush3.bf16.msra.mxu0 %v347_v4  ;;  %322 = vmatpush3.bf16.msra.mxu1 %v351_v7  ;;  %p434_p13 = por %p433_p12, %p432_p11 }
  0x42   :  { %311 = vmatprep.subr.bf16.mxu0 %v460_v0  ;;  %323 = vmatprep.subr.bf16.mxu1 %v460_v0 }
  0x43   :  { %p435_p0 = pnand %p434_p13, %p428_p10 }
  0x45   :  { %312 = vmatpush3.bf16.msra.mxu0 %v348_v6  ;;  %324 = vmatpush3.bf16.msra.mxu1 %v352_v9 }
  0x46   :  { %325 = vmatprep.subr.bf16.mxu1 %v460_v0 }
  0x48   :  { %314 = vmatmul.mubr.msk.bf16.vlgmr.msra.gmra.mrb[0].mxu0 %vm101_vm1, %v61_v8 }
  0x49   :  { %326 = vmatpush3.bf16.msra.mxu1 %v353_v10 }
  0x4a   :  { %327 = vmatprep.subr.bf16.mxu1 %v460_v0 }
  0x4d   :  { %328 = vmatpush3.bf16.msra.mxu1 %v354_v11 }
  0x4e   :  { %329 = vmatprep.subr.bf16.mxu1 %v460_v0 }
  0x51   :  { %330 = vmatpush3.bf16.msra.mxu1 %v355_v12 }
  0x52   :  { %331 = vmatprep.subr.bf16.mxu1 %v460_v0 }
  0x55   :  { %332 = vmatpush3.bf16.msra.mxu1 %v356_v13 }
 0x11b   :  { %v139_v15 = vpop.f32.mrb[0].mxu0 }
 0x11c   :  { %v140_v16 = vadd.f32 %v276_v14, %v139_v15  ;;  %v315_v17 = vpop.f32.mrb[1].mxu0 }
 0x11d   :  { %v142_v18 = vpop.f32.mrb[2].mxu0 }
 0x11e   :  { %357 = vtanh.f32 %v140_v16  ;;  %v316_v19 = vpop.f32.mrb[3].mxu0 }
 0x128   :  { %v358_v20 = vpop.eup %357 }
 0x129   :  { %v146_v21 = vpack.c.bf16 %v358_v20, %v358_v20 }
 0x12b   :  { %334 = vmatmul.mubr.bf16.vlgmr.msra.gmra.mrb[0].mxu1 %v146_v21 }
 0x1fe   :  { %v252_v23 = vpop.f32.mrb[0].mxu1 }
 0x1ff   :  { %v253_v24 = vadd.f32 %v282_v22, %v252_v23  ;;  %v335_v25 = vpop.f32.mrb[1].mxu1 }
 0x200   :  { %v255_v26 = vpop.f32.mrb[2].mxu1 }
 0x201   :  { %359 = vtanh.f32 %v253_v24  ;;  %v336_v27 = vpop.f32.mrb[3].mxu1 }
 0x20b   :  { %v360_v28 = vpop.eup %359 }
 0x20c   :  { %259 = vst [vmem:[#allocation8] sm:$0xff] %v360_v28 }
 0x20d   :  { %438 = shalt.err (!%p435_p0)
}
 0x20e   :  { %s439_s10 = scalar_lea.hbm %s558_s5, 128 }
 0x20f   :  { %p440_p1 = scmp.ne.s32.totalorder %s558_s5, %s439_s10  ;;  %p443_p2 = scmp.lt.u32.totalorder %s439_s10, %s558_s5 }
 0x211   :  { %p445_p3 = pnand %p443_p2, %p440_p1 }
 0x213   :  { %448 = shalt.err (!%p445_p3)
}
 0x214   :  { %269 = dma.vmem_to_hbm [thread:$0]  %s267_s7, 128, %s558_s5, [#allocation4]  }
 0x215   :  { %453 = dma.done.wait [#allocation4], 128  }
 0x216   :  { %454 = vsyncadd [#allocation4], 4294967168 }
 0x217   :  { %273 = vsyncpa [#allocation3], 1 }
 0x218   :  { %274 = vsyncpa [#allocation6], 1 }
 0x219   :  { %275 = vsyncpa [#allocation4], 1 }

</bundles_post_ra>
